<compile_context>
chip_gen: v6e
topology: v6e:2x2x1
jax: 0.10.0
libtpu: 0.0.40
codegen_flags: <defaults>
</compile_context>

<pallas_src>
import jax
import jax.numpy as jnp
from jax import lax
from jax.experimental import pallas as pl
from jax.experimental.pallas import tpu as pltpu


# ----------------------------------------------------------------------------
# helpers
# ----------------------------------------------------------------------------
_TWO_TILE_MIN_B = 1024          # force grid >= 2 above this batch (v7x 2 TCs)
_DEFAULT_MAX_TILE_B = 8192      # hard ceiling on the streamed batch tile


def _round_up(n, m):
    return ((n + m - 1) // m) * m


def _sublane_mult(dtype):
    # rows per vreg sublane group: 8 for 4-byte, 16 for 2-byte, 32 for 1-byte
    return max(8, 32 // jnp.dtype(dtype).itemsize)


def _padded_vmem_bytes(shape, dtype):
    # VMEM layout pads second-to-last dim to the sublane multiple, last to 128
    r = shape[-2] if len(shape) >= 2 else 1
    c = shape[-1]
    sm = _sublane_mult(dtype)
    return _round_up(r, sm) * _round_up(c, 128) * jnp.dtype(dtype).itemsize


def _vmem_physical_bytes():
    try:
        info = pltpu.get_tpu_info()
        for attr in ("vmem_capacity_bytes", "vmem_bytes", "vmem_size_bytes"):
            v = getattr(info, attr, None)
            if v:
                return int(v)
    except Exception:
        pass
    return 64 * 1024 * 1024     # conservative (v7x per-TC VMEM)


def _pick_sub_tile(tile_b, sub_mult, target):
    """Largest divisor of tile_b that is a multiple of sub_mult and <= target."""
    if tile_b <= target:
        return tile_b
    best = sub_mult
    s = sub_mult
    while s <= target:
        if tile_b % s == 0:
            best = s
        s += sub_mult
    return best


# ----------------------------------------------------------------------------
# kernel
# ----------------------------------------------------------------------------
def _make_kernel(sub_b, n_sub):
    def kernel(x_ref, w1_ref, b1_ref, w2_ref, b2_ref, w3_ref, b3_ref, out_ref):
        # weights/biases are VMEM-resident across the whole grid
        w1 = w1_ref[...]
        w2 = w2_ref[...]
        w3 = w3_ref[...]
        b1 = b1_ref[...]
        b2 = b2_ref[...]
        b3 = b3_ref[...]

        def compute(xs):
            # fc1 + ReLU (MXU matmul, f32 accumulation; bias/ReLU in f32)
            h1 = jnp.dot(xs, w1, preferred_element_type=jnp.float32)
            h1 = jnp.maximum(h1 + b1, 0.0).astype(w2.dtype)
            # fc2 + ReLU
            h2 = jnp.dot(h1, w2, preferred_element_type=jnp.float32)
            h2 = jnp.maximum(h2 + b2, 0.0).astype(w3.dtype)
            # fc3 (logits)
            return jnp.dot(h2, w3, preferred_element_type=jnp.float32) + b3

        if n_sub == 1:
            out_ref[...] = compute(x_ref[...].astype(w1.dtype)).astype(out_ref.dtype)
        else:
            # walk the big streamed tile in small sub-chunks so h1/h2 live
            # ranges stay a few hundred KiB (no multi-MiB activation scratch)
            def body(s, carry):
                r = pl.multiple_of(s * sub_b, sub_b)
                xs = x_ref[pl.ds(r, sub_b), :].astype(w1.dtype)
                out_ref[pl.ds(r, sub_b), :] = compute(xs).astype(out_ref.dtype)
                return carry

            lax.fori_loop(0, n_sub, body, 0, unroll=(n_sub <= 8))

    return kernel


# ----------------------------------------------------------------------------
# wrapper
# ----------------------------------------------------------------------------
def domain_classifier_forward(x, params, *, max_tile_b=None,
                              out_dtype=jnp.float32, sub_tile_rows=512):
    """x: [B, input_dim].  params: dict w1,b1,w2,b2,w3,b3 (w: [in,out], b: [*,out]).

    x / weights are consumed at whatever dtype the caller provides (e.g. hand
    over bf16 x + bf16 weights for halved HBM traffic); accumulation is f32.
    """
    if x.ndim != 2:
        raise ValueError(f"expected x of shape [B, input_dim], got {x.shape}")

    w1, w2, w3 = params["w1"], params["w2"], params["w3"]
    # biases are added post-accumulation -> keep f32 (tiny, negligible cast)
    b1 = params["b1"].astype(jnp.float32).reshape(1, -1)
    b2 = params["b2"].astype(jnp.float32).reshape(1, -1)
    b3 = params["b3"].astype(jnp.float32).reshape(1, -1)

    B, d_in = x.shape
    h1d, h2d, d_out = w1.shape[1], w2.shape[1], w3.shape[1]
    assert w1.shape[0] == d_in and w2.shape[0] == h1d and w3.shape[0] == h2d

    x_item = jnp.dtype(x.dtype).itemsize
    out_item = jnp.dtype(out_dtype).itemsize
    sub_mult = _sublane_mult(x.dtype)

    # ---- VMEM budget (generation-aware) ------------------------------------
    vmem_phys = _vmem_physical_bytes()
    vmem_limit = min(int(0.75 * vmem_phys), 100 * 1024 * 1024)

    w_resident = sum(_padded_vmem_bytes(a.shape, a.dtype)
                     for a in (w1, b1, w2, b2, w3, b3))
    # TODO(synk): if w1 alone exceeds ~1/4 of physical VMEM (very large
    # input_dim), fall back to K-tiling over d_in with an f32 accumulator
    # scratch instead of forcing full weight residency.
    margin = 4 * 1024 * 1024
    per_row = (2 * _round_up(d_in, 128) * x_item            # double-buffered x
               + 2 * _round_up(d_out, 128) * out_item)      # out pads to 128 lanes
    tile_cap = max(sub_mult, (vmem_limit - w_resident - margin) // per_row)

    eff_max = _DEFAULT_MAX_TILE_B if max_tile_b is None else int(max_tile_b)
    eff_max = max(sub_mult, min(eff_max, int(tile_cap)))
    eff_max = (eff_max // sub_mult) * sub_mult

    # ---- batch tiling -------------------------------------------------------
    n_tiles = pl.cdiv(B, eff_max)
    if n_tiles < 2 and B >= _TWO_TILE_MIN_B:
        n_tiles = 2          # keep both v7x TensorCores busy (no-op v5e/v6e)
    tile_b = _round_up(pl.cdiv(B, n_tiles), sub_mult)
    b_pad = _round_up(B, tile_b)
    grid = (b_pad // tile_b,)

    if b_pad != B:
        # at most one tile of padding; zero whenever B divides the tile
        x = jnp.pad(x, ((0, b_pad - B), (0, 0)))

    sub_b = _pick_sub_tile(tile_b, sub_mult, target=max(sub_mult, sub_tile_rows))
    n_sub = tile_b // sub_b
    kernel = _make_kernel(sub_b, n_sub)

    # ---- advisory cost estimate --------------------------------------------
    flops = 2 * b_pad * (d_in * h1d + h1d * h2d + h2d * d_out)
    bytes_accessed = (b_pad * d_in * x_item + b_pad * d_out * out_item
                      + sum(int(a.size) * jnp.dtype(a.dtype).itemsize
                            for a in (w1, b1, w2, b2, w3, b3)))
    cost = pl.CostEstimate(flops=flops, transcendentals=0,
                           bytes_accessed=bytes_accessed)

    def build(single_buffer_weights):
        def resident(shape):
            idx = lambda i: (0, 0)
            if single_buffer_weights:
                # block index never changes -> single buffer, half the VMEM
                return pl.BlockSpec(shape, idx, pipeline_mode=pl.Buffered(1))
            return pl.BlockSpec(shape, idx)

        return pl.pallas_call(
            kernel,
            out_shape=jax.ShapeDtypeStruct((b_pad, d_out), out_dtype),
            grid=grid,
            in_specs=[
                pl.BlockSpec((tile_b, d_in), lambda i: (i, 0)),   # streamed x
                resident(w1.shape), resident(b1.shape),
                resident(w2.shape), resident(b2.shape),
                resident(w3.shape), resident(b3.shape),
            ],
            out_specs=pl.BlockSpec((tile_b, d_out), lambda i: (i, 0)),
            compiler_params=pltpu.CompilerParams(
                dimension_semantics=("parallel",),   # v7x: shard tiles over 2 TCs
                vmem_limit_bytes=int(vmem_limit),
            ),
            cost_estimate=cost,
        )

    try:
        out_padded = build(True)(x, w1, b1, w2, b2, w3, b3)
    except Exception:
        # pipeline_mode=pl.Buffered(1) not supported on this jax build ->
        # plain (double-buffered) resident specs; correctness identical.
        out_padded = build(False)(x, w1, b1, w2, b2, w3, b3)

    return out_padded[:B] if b_pad != B else out_padded


# ----------------------------------------------------------------------------
# params / reference
# ----------------------------------------------------------------------------
def init_params(key, input_dim, hidden_dim1, hidden_dim2, out_dim=2,
                dtype=jnp.float32):
    """Deterministic init mimicking nn.Linear's U(-1/sqrt(fan_in), 1/sqrt(fan_in))."""
    keys = jax.random.split(key, 6)

    def linear(kw, kb, fan_in, fan_out):
        bound = 1.0 / jnp.sqrt(fan_in)
        # stored as [in, out] (transpose of torch's [out, in])
        w = jax.random.uniform(kw, (fan_in, fan_out), jnp.float32, -bound, bound)
        b = jax.random.uniform(kb, (1, fan_out), jnp.float32, -bound, bound)
        return w.astype(dtype), b.astype(jnp.float32)

    w1, b1 = linear(keys[0], keys[1], input_dim, hidden_dim1)
    w2, b2 = linear(keys[2], keys[3], hidden_dim1, hidden_dim2)
    w3, b3 = linear(keys[4], keys[5], hidden_dim2, out_dim)
    return {"w1": w1, "b1": b1, "w2": w2, "b2": b2, "w3": w3, "b3": b3}


def reference_forward(x, p):
    x = x.astype(jnp.float32)
    w1 = p["w1"].astype(jnp.float32)
    w2 = p["w2"].astype(jnp.float32)
    w3 = p["w3"].astype(jnp.float32)
    h1 = jnp.maximum(x @ w1 + p["b1"], 0.0)
    h2 = jnp.maximum(h1 @ w2 + p["b2"], 0.0)
    return h2 @ w3 + p["b3"]


# ----------------------------------------------------------------------------
# demo / self-test
# ----------------------------------------------------------------------------
if __name__ == "__main__":
    key = jax.random.PRNGKey(0)
    k_x, k_p, k_x2, k_x3 = jax.random.split(key, 4)

    batch, input_dim, hidden_dim1, hidden_dim2 = 8, 32, 64, 32
    x = jax.random.normal(k_x, (batch, input_dim), jnp.float32)
    params = init_params(k_p, input_dim, hidden_dim1, hidden_dim2)

    # 1) f32 path, single tile, single sub-chunk
    out = domain_classifier_forward(x, params)
    jax.block_until_ready(out)
    ref = reference_forward(x, params)
    assert out.shape == (batch, 2), out.shape
    assert jnp.allclose(out, ref, atol=1e-4, rtol=1e-4), "f32 mismatch vs reference"

    # 2) multi-tile grid with batch padding (B=100 not a tile multiple)
    x2 = jax.random.normal(k_x2, (100, input_dim), jnp.float32)
    out2 = domain_classifier_forward(x2, params, max_tile_b=32)
    jax.block_until_ready(out2)
    ref2 = reference_forward(x2, params)
    assert out2.shape == (100, 2), out2.shape
    assert jnp.allclose(out2, ref2, atol=1e-4, rtol=1e-4), "tiled mismatch vs reference"

    # 3) bf16 HBM-streaming path: caller hands over bf16 x + bf16 weights
    #    (no wrapper-side cast); accumulation stays f32.
    params_bf16 = init_params(k_p, input_dim, hidden_dim1, hidden_dim2,
                              dtype=jnp.bfloat16)
    x_bf16 = x.astype(jnp.bfloat16)   # demo stand-in for a bf16 producer
    out_bf16 = domain_classifier_forward(x_bf16, params_bf16)
    jax.block_until_ready(out_bf16)
    assert out_bf16.shape == (batch, 2), out_bf16.shape
    assert float(jnp.max(jnp.abs(out_bf16.astype(jnp.float32) - ref))) < 0.1, \
        "bf16 mismatch vs reference"

    # 4) large batch: forces grid >= 2 and the in-kernel sub-chunk loop
    x3 = jax.random.normal(k_x3, (2048, input_dim), jnp.float32)
    out3 = domain_classifier_forward(x3, params)
    jax.block_until_ready(out3)
    ref3 = reference_forward(x3, params)
    assert out3.shape == (2048, 2), out3.shape
    assert jnp.allclose(out3, ref3, atol=1e-4, rtol=1e-4), \
        "large-batch mismatch vs reference"

    print("KERNEL_OK")
</pallas_src>

<mosaic_0001>
module attributes {stable_mosaic.version = 11 : i64} {
  func.func @kernel(%arg0: i32, %arg1: memref<8x32xf32, #tpu.memory_space<vmem>>, %arg2: memref<32x64xf32, #tpu.memory_space<vmem>>, %arg3: memref<1x64xf32, #tpu.memory_space<vmem>>, %arg4: memref<64x32xf32, #tpu.memory_space<vmem>>, %arg5: memref<1x32xf32, #tpu.memory_space<vmem>>, %arg6: memref<32x2xf32, #tpu.memory_space<vmem>>, %arg7: memref<1x2xf32, #tpu.memory_space<vmem>>, %arg8: memref<8x2xf32, #tpu.memory_space<vmem>>) attributes {dimension_semantics = [#tpu.dimension_semantics<parallel>], iteration_bounds = array<i64: 1>, scalar_prefetch = 0 : i64, scratch_operands = 0 : i64, tpu.core_type = #tpu.core_type<tc>, window_params = [{transform_indices = @transform_0, window_bounds = array<i64: 8, 32>}, {pipeline_mode = #tpu.pipeline_mode<synchronous>, transform_indices = @transform_1, window_bounds = array<i64: 32, 64>}, {pipeline_mode = #tpu.pipeline_mode<synchronous>, transform_indices = @transform_2, window_bounds = array<i64: 1, 64>}, {pipeline_mode = #tpu.pipeline_mode<synchronous>, transform_indices = @transform_3, window_bounds = array<i64: 64, 32>}, {pipeline_mode = #tpu.pipeline_mode<synchronous>, transform_indices = @transform_4, window_bounds = array<i64: 1, 32>}, {pipeline_mode = #tpu.pipeline_mode<synchronous>, transform_indices = @transform_5, window_bounds = array<i64: 32, 2>}, {pipeline_mode = #tpu.pipeline_mode<synchronous>, transform_indices = @transform_6, window_bounds = array<i64: 1, 2>}, {transform_indices = @transform_7, window_bounds = array<i64: 8, 2>}]} {
    %c0 = arith.constant 0 : index
    %c0_0 = arith.constant 0 : index
    %0 = vector.load %arg2[%c0, %c0_0] : memref<32x64xf32, #tpu.memory_space<vmem>>, vector<32x64xf32>
    %c0_1 = arith.constant 0 : index
    %c0_2 = arith.constant 0 : index
    %1 = vector.load %arg4[%c0_1, %c0_2] : memref<64x32xf32, #tpu.memory_space<vmem>>, vector<64x32xf32>
    %c0_3 = arith.constant 0 : index
    %c0_4 = arith.constant 0 : index
    %2 = vector.load %arg6[%c0_3, %c0_4] : memref<32x2xf32, #tpu.memory_space<vmem>>, vector<32x2xf32>
    %c0_5 = arith.constant 0 : index
    %c0_6 = arith.constant 0 : index
    %3 = vector.load %arg3[%c0_5, %c0_6] : memref<1x64xf32, #tpu.memory_space<vmem>>, vector<1x64xf32>
    %c0_7 = arith.constant 0 : index
    %c0_8 = arith.constant 0 : index
    %4 = vector.load %arg5[%c0_7, %c0_8] : memref<1x32xf32, #tpu.memory_space<vmem>>, vector<1x32xf32>
    %c0_9 = arith.constant 0 : index
    %c0_10 = arith.constant 0 : index
    %5 = vector.load %arg7[%c0_9, %c0_10] : memref<1x2xf32, #tpu.memory_space<vmem>>, vector<1x2xf32>
    %c0_11 = arith.constant 0 : index
    %c0_12 = arith.constant 0 : index
    %6 = vector.load %arg1[%c0_11, %c0_12] : memref<8x32xf32, #tpu.memory_space<vmem>>, vector<8x32xf32>
    %cst = arith.constant dense<0.000000e+00> : vector<8x64xf32>
    %7 = tpu.matmul %6, %0, %cst {dimension_numbers = #tpu.dot_dimension_numbers<[1], [0], [0], [1], [0, 0, 1, 1], [], []>} : vector<8x32xf32>, vector<32x64xf32>, vector<8x64xf32> -> vector<8x64xf32>
    %8 = vector.broadcast %3 : vector<1x64xf32> to vector<8x64xf32>
    %9 = arith.addf %7, %8 : vector<8x64xf32>
    %cst_13 = arith.constant 0.000000e+00 : f32
    %10 = vector.broadcast %cst_13 : f32 to vector<8x64xf32>
    %11 = arith.maximumf %9, %10 : vector<8x64xf32>
    %cst_14 = arith.constant dense<0.000000e+00> : vector<8x32xf32>
    %12 = tpu.matmul %11, %1, %cst_14 {dimension_numbers = #tpu.dot_dimension_numbers<[1], [0], [0], [1], [0, 0, 1, 1], [], []>} : vector<8x64xf32>, vector<64x32xf32>, vector<8x32xf32> -> vector<8x32xf32>
    %13 = vector.broadcast %4 : vector<1x32xf32> to vector<8x32xf32>
    %14 = arith.addf %12, %13 : vector<8x32xf32>
    %cst_15 = arith.constant 0.000000e+00 : f32
    %15 = vector.broadcast %cst_15 : f32 to vector<8x32xf32>
    %16 = arith.maximumf %14, %15 : vector<8x32xf32>
    %cst_16 = arith.constant dense<0.000000e+00> : vector<8x2xf32>
    %17 = tpu.matmul %16, %2, %cst_16 {dimension_numbers = #tpu.dot_dimension_numbers<[1], [0], [0], [1], [0, 0, 1, 1], [], []>} : vector<8x32xf32>, vector<32x2xf32>, vector<8x2xf32> -> vector<8x2xf32>
    %18 = vector.broadcast %5 : vector<1x2xf32> to vector<8x2xf32>
    %19 = arith.addf %17, %18 : vector<8x2xf32>
    %c0_17 = arith.constant 0 : index
    %c0_18 = arith.constant 0 : index
    %20 = vector.load %arg8[%c0_17, %c0_18] : memref<8x2xf32, #tpu.memory_space<vmem>>, vector<8x2xf32>
    tpu.vector_store %arg8[%c0_17, %c0_18], %19 {strides = array<i32>} : memref<8x2xf32, #tpu.memory_space<vmem>>, vector<8x2xf32>,
    return
  }
  func.func @transform_0(%arg0: i32) -> (i32, i32) {
    %c0_i32 = arith.constant 0 : i32
    %c0_i32_0 = arith.constant 0 : i32
    return %arg0, %c0_i32 : i32, i32
  }
  func.func @transform_1(%arg0: i32) -> (i32, i32) {
    %c0_i32 = arith.constant 0 : i32
    %c0_i32_0 = arith.constant 0 : i32
    %c0_i32_1 = arith.constant 0 : i32
    return %c0_i32, %c0_i32_0 : i32, i32
  }
  func.func @transform_2(%arg0: i32) -> (i32, i32) {
    %c0_i32 = arith.constant 0 : i32
    %c0_i32_0 = arith.constant 0 : i32
    %c0_i32_1 = arith.constant 0 : i32
    return %c0_i32, %c0_i32_0 : i32, i32
  }
  func.func @transform_3(%arg0: i32) -> (i32, i32) {
    %c0_i32 = arith.constant 0 : i32
    %c0_i32_0 = arith.constant 0 : i32
    %c0_i32_1 = arith.constant 0 : i32
    return %c0_i32, %c0_i32_0 : i32, i32
  }
  func.func @transform_4(%arg0: i32) -> (i32, i32) {
    %c0_i32 = arith.constant 0 : i32
    %c0_i32_0 = arith.constant 0 : i32
    %c0_i32_1 = arith.constant 0 : i32
    return %c0_i32, %c0_i32_0 : i32, i32
  }
  func.func @transform_5(%arg0: i32) -> (i32, i32) {
    %c0_i32 = arith.constant 0 : i32
    %c0_i32_0 = arith.constant 0 : i32
    %c0_i32_1 = arith.constant 0 : i32
    return %c0_i32, %c0_i32_0 : i32, i32
  }
  func.func @transform_6(%arg0: i32) -> (i32, i32) {
    %c0_i32 = arith.constant 0 : i32
    %c0_i32_0 = arith.constant 0 : i32
    %c0_i32_1 = arith.constant 0 : i32
    return %c0_i32, %c0_i32_0 : i32, i32
  }
  func.func @transform_7(%arg0: i32) -> (i32, i32) {
    %c0_i32 = arith.constant 0 : i32
    %c0_i32_0 = arith.constant 0 : i32
    return %arg0, %c0_i32 : i32, i32
  }
}

module attributes {stable_mosaic.version = 11 : i64} {
  func.func @kernel(%arg0: i32, %arg1: memref<8x32xf32, #tpu.memory_space<vmem>>, %arg2: memref<32x64xf32, #tpu.memory_space<vmem>>, %arg3: memref<1x64xf32, #tpu.memory_space<vmem>>, %arg4: memref<64x32xf32, #tpu.memory_space<vmem>>, %arg5: memref<1x32xf32, #tpu.memory_space<vmem>>, %arg6: memref<32x2xf32, #tpu.memory_space<vmem>>, %arg7: memref<1x2xf32, #tpu.memory_space<vmem>>, %arg8: memref<8x2xf32, #tpu.memory_space<vmem>>) attributes {dimension_semantics = [#tpu.dimension_semantics<parallel>], iteration_bounds = array<i64: 1>, scalar_prefetch = 0 : i64, scratch_operands = 0 : i64, tpu.core_type = #tpu.core_type<tc>, window_params = [{transform_indices = @transform_0, window_bounds = array<i64: 8, 32>}, {pipeline_mode = #tpu.pipeline_mode<synchronous>, transform_indices = @transform_1, window_bounds = array<i64: 32, 64>}, {pipeline_mode = #tpu.pipeline_mode<synchronous>, transform_indices = @transform_2, window_bounds = array<i64: 1, 64>}, {pipeline_mode = #tpu.pipeline_mode<synchronous>, transform_indices = @transform_3, window_bounds = array<i64: 64, 32>}, {pipeline_mode = #tpu.pipeline_mode<synchronous>, transform_indices = @transform_4, window_bounds = array<i64: 1, 32>}, {pipeline_mode = #tpu.pipeline_mode<synchronous>, transform_indices = @transform_5, window_bounds = array<i64: 32, 2>}, {pipeline_mode = #tpu.pipeline_mode<synchronous>, transform_indices = @transform_6, window_bounds = array<i64: 1, 2>}, {transform_indices = @transform_7, window_bounds = array<i64: 8, 2>}]} {
    %c0 = arith.constant 0 : index
    %c0_0 = arith.constant 0 : index
    %0 = vector.load %arg2[%c0, %c0_0] : memref<32x64xf32, #tpu.memory_space<vmem>>, vector<32x64xf32>
    %c0_1 = arith.constant 0 : index
    %c0_2 = arith.constant 0 : index
    %1 = vector.load %arg4[%c0_1, %c0_2] : memref<64x32xf32, #tpu.memory_space<vmem>>, vector<64x32xf32>
    %c0_3 = arith.constant 0 : index
    %c0_4 = arith.constant 0 : index
    %2 = vector.load %arg6[%c0_3, %c0_4] : memref<32x2xf32, #tpu.memory_space<vmem>>, vector<32x2xf32>
    %c0_5 = arith.constant 0 : index
    %c0_6 = arith.constant 0 : index
    %3 = vector.load %arg3[%c0_5, %c0_6] : memref<1x64xf32, #tpu.memory_space<vmem>>, vector<1x64xf32>
    %c0_7 = arith.constant 0 : index
    %c0_8 = arith.constant 0 : index
    %4 = vector.load %arg5[%c0_7, %c0_8] : memref<1x32xf32, #tpu.memory_space<vmem>>, vector<1x32xf32>
    %c0_9 = arith.constant 0 : index
    %c0_10 = arith.constant 0 : index
    %5 = vector.load %arg7[%c0_9, %c0_10] : memref<1x2xf32, #tpu.memory_space<vmem>>, vector<1x2xf32>
    %c0_11 = arith.constant 0 : index
    %c0_12 = arith.constant 0 : index
    %6 = vector.load %arg1[%c0_11, %c0_12] : memref<8x32xf32, #tpu.memory_space<vmem>>, vector<8x32xf32>
    %cst = arith.constant dense<0.000000e+00> : vector<8x64xf32>
    %7 = tpu.matmul %6, %0, %cst {dimension_numbers = #tpu.dot_dimension_numbers<[1], [0], [0], [1], [0, 0, 1, 1], [], []>} : vector<8x32xf32>, vector<32x64xf32>, vector<8x64xf32> -> vector<8x64xf32>
    %8 = vector.broadcast %3 : vector<1x64xf32> to vector<8x64xf32>
    %9 = arith.addf %7, %8 : vector<8x64xf32>
    %cst_13 = arith.constant 0.000000e+00 : f32
    %10 = vector.broadcast %cst_13 : f32 to vector<8x64xf32>
    %11 = arith.maximumf %9, %10 : vector<8x64xf32>
    %cst_14 = arith.constant dense<0.000000e+00> : vector<8x32xf32>
    %12 = tpu.matmul %11, %1, %cst_14 {dimension_numbers = #tpu.dot_dimension_numbers<[1], [0], [0], [1], [0, 0, 1, 1], [], []>} : vector<8x64xf32>, vector<64x32xf32>, vector<8x32xf32> -> vector<8x32xf32>
    %13 = vector.broadcast %4 : vector<1x32xf32> to vector<8x32xf32>
    %14 = arith.addf %12, %13 : vector<8x32xf32>
    %cst_15 = arith.constant 0.000000e+00 : f32
    %15 = vector.broadcast %cst_15 : f32 to vector<8x32xf32>
    %16 = arith.maximumf %14, %15 : vector<8x32xf32>
    %cst_16 = arith.constant dense<0.000000e+00> : vector<8x2xf32>
    %17 = tpu.matmul %16, %2, %cst_16 {dimension_numbers = #tpu.dot_dimension_numbers<[1], [0], [0], [1], [0, 0, 1, 1], [], []>} : vector<8x32xf32>, vector<32x2xf32>, vector<8x2xf32> -> vector<8x2xf32>
    %18 = vector.broadcast %5 : vector<1x2xf32> to vector<8x2xf32>
    %19 = arith.addf %17, %18 : vector<8x2xf32>
    %c0_17 = arith.constant 0 : index
    %c0_18 = arith.constant 0 : index
    %20 = vector.load %arg8[%c0_17, %c0_18] : memref<8x2xf32, #tpu.memory_space<vmem>>, vector<8x2xf32>
    tpu.vector_store %arg8[%c0_17, %c0_18], %19 {strides = array<i32>} : memref<8x2xf32, #tpu.memory_space<vmem>>, vector<8x2xf32>,
    return
  }
  func.func @transform_0(%arg0: i32) -> (i32, i32) {
    %c0_i32 = arith.constant 0 : i32
    %c0_i32_0 = arith.constant 0 : i32
    return %arg0, %c0_i32 : i32, i32
  }
  func.func @transform_1(%arg0: i32) -> (i32, i32) {
    %c0_i32 = arith.constant 0 : i32
    %c0_i32_0 = arith.constant 0 : i32
    %c0_i32_1 = arith.constant 0 : i32
    return %c0_i32, %c0_i32_0 : i32, i32
  }
  func.func @transform_2(%arg0: i32) -> (i32, i32) {
    %c0_i32 = arith.constant 0 : i32
    %c0_i32_0 = arith.constant 0 : i32
    %c0_i32_1 = arith.constant 0 : i32
    return %c0_i32, %c0_i32_0 : i32, i32
  }
  func.func @transform_3(%arg0: i32) -> (i32, i32) {
    %c0_i32 = arith.constant 0 : i32
    %c0_i32_0 = arith.constant 0 : i32
    %c0_i32_1 = arith.constant 0 : i32
    return %c0_i32, %c0_i32_0 : i32, i32
  }
  func.func @transform_4(%arg0: i32) -> (i32, i32) {
    %c0_i32 = arith.constant 0 : i32
    %c0_i32_0 = arith.constant 0 : i32
    %c0_i32_1 = arith.constant 0 : i32
    return %c0_i32, %c0_i32_0 : i32, i32
  }
  func.func @transform_5(%arg0: i32) -> (i32, i32) {
    %c0_i32 = arith.constant 0 : i32
    %c0_i32_0 = arith.constant 0 : i32
    %c0_i32_1 = arith.constant 0 : i32
    return %c0_i32, %c0_i32_0 : i32, i32
  }
  func.func @transform_6(%arg0: i32) -> (i32, i32) {
    %c0_i32 = arith.constant 0 : i32
    %c0_i32_0 = arith.constant 0 : i32
    %c0_i32_1 = arith.constant 0 : i32
    return %c0_i32, %c0_i32_0 : i32, i32
  }
  func.func @transform_7(%arg0: i32) -> (i32, i32) {
    %c0_i32 = arith.constant 0 : i32
    %c0_i32_0 = arith.constant 0 : i32
    return %arg0, %c0_i32 : i32, i32
  }
}

</mosaic_0001>

<bundles_post_ra>
// kernel: tpu_custom_call.1
= control target key start
LH: loop header
LB: loop body
LE: loop exit
PB: predicated region body
PF: predicated region fallthrough
CT: control target
= control target key end

     0   :  { %v361_v0 = vmov 0.0   ;;  %vm362_vm0 = vmmov 0   ;;  %vm52_vm1 = vcmask 261120   ;;  %vm133_vm2 = vcmask 523264   ;;  %s471_s1 = inlined_call_operand.vmem [shape: f32[32,64], index: 1, kind: input, shape index: {}]   ;;  %s472_s3 = inlined_call_operand.vmem [shape: f32[64,32], index: 3, kind: input, shape index: {}]   ;;  %s473_s0 = inlined_call_operand.vmem [shape: f32[8,32], index: 0, kind: input, shape index: {}]   ;;  %s474_s5 = inlined_call_operand.vmem [shape: f32[32,2], index: 5, kind: input, shape index: {}]   ;;  %s475_s2 = inlined_call_operand.vmem [shape: f32[1,64], index: 2, kind: input, shape index: {}]   ;;  %s476_s4 = inlined_call_operand.vmem [shape: f32[1,32], index: 4, kind: input, shape index: {}]   ;;  %s477_s6 = inlined_call_operand.vmem [shape: f32[1,2], index: 6, kind: input, shape index: {}]   ;;  %s478_s7 = inlined_call_operand.vmem [shape: f32[8,2], index: 7, kind: output, shape index: {}]  }
   0x1   :  { %318 = vmatprep.subr.mxu0 %v361_v0  ;;  %v29_v1 = vld [vmem:[%s471_s1 + $0x18] sm:$0xff]  ;;  %v28_v2 = vld [vmem:[%s471_s1 + $0x10] sm:$0xff]  ;;  %326 = vmatprep.mubr.msk.f32.mxu0 %vm362_vm0, %v361_v0  ;;  %v27_v4 = vld [vmem:[%s471_s1 + $0x8] sm:$0xff]  ;;  %vm287_vm3 = vcmask 15360  }
   0x2   :  { %319 = vmatpush3.msra.mxu0 %v29_v1  ;;  %329 = vmatprep.subr.mxu1 %v361_v0  ;;  %v37_v3 = vld [vmem:[%s472_s3 + $0x38] sm:$0xff]  ;;  %v36_v5 = vld [vmem:[%s472_s3 + $0x30] sm:$0xff]  ;;  %v35_v6 = vld [vmem:[%s472_s3 + $0x28] sm:$0xff] }
   0x3   :  { %320 = vmatprep.subr.mxu0 %v361_v0  ;;  %330 = vmatpush3.msra.mxu1 %v37_v3  ;;  %v26_v7 = vld [vmem:[%s471_s1] sm:$0xff]  ;;  %v33_v10 = vld [vmem:[%s472_s3 + $0x18] sm:$0xff]  ;;  %v32_v11 = vld [vmem:[%s472_s3 + $0x10] sm:$0xff] }
   0x4   :  { %321 = vmatpush3.msra.mxu0 %v28_v2  ;;  %331 = vmatprep.subr.mxu1 %v361_v0  ;;  %v45_v8 = vld [vmem:[%s473_s0] sm:$0xff]  ;;  %v31_v12 = vld [vmem:[%s472_s3 + $0x8] sm:$0xff]  ;;  %v41_v14 = vld [vmem:[%s474_s5 + $0x18] sm:$0xff] }
   0x5   :  { %322 = vmatprep.subr.mxu0 %v361_v0  ;;  %332 = vmatpush3.msra.mxu1 %v36_v5  ;;  %v34_v9 = vld [vmem:[%s472_s3 + $0x20] sm:$0xff]  ;;  %v40_v20 = vld [vmem:[%s474_s5 + $0x10] sm:$0xff]  ;;  %v39_v21 = vld [vmem:[%s474_s5 + $0x8] sm:$0xff] }
   0x6   :  { %323 = vmatpush3.msra.mxu0 %v27_v4  ;;  %333 = vmatprep.subr.mxu1 %v361_v0  ;;  %v30_v13 = vld [vmem:[%s472_s3] sm:$0xff] }
   0x7   :  { %324 = vmatprep.subr.mxu0 %v361_v0  ;;  %334 = vmatpush3.msra.mxu1 %v35_v6  ;;  %v293_v15 = vld [vmem:[%s475_s2] ss:$0 sm:$0xff] }
   0x8   :  { %325 = vmatpush3.msra.mxu0 %v26_v7  ;;  %335 = vmatprep.subr.mxu1 %v361_v0  ;;  %v38_v22 = vld [vmem:[%s474_s5] sm:$0xff] }
   0x9   :  { %327 = vmatmul.mubr.msk.f32.vlgmr.msra.gmra.mxu0 %vm52_vm1, %v45_v8  ;;  %336 = vmatpush3.msra.mxu1 %v34_v9  ;;  %v295_v23 = vld [vmem:[%s476_s4] ss:$0 sm:$0xff] }
   0xa   :  { %337 = vmatprep.subr.mxu1 %v361_v0  ;;  %345 = vmatprep.mubr.msk.f32.mxu1 %vm362_vm0, %v361_v0  ;;  %v297_v28 = vld [vmem:[%s477_s6] ss:$0 sm:$0xff] }
   0xb   :  { %338 = vmatpush3.msra.mxu1 %v33_v10  ;;  %348 = vmatprep.subr.mxu0 %v361_v0 }
   0xc   :  { %339 = vmatprep.subr.mxu1 %v361_v0  ;;  %356 = vmatprep.mubr.msk.f32.mxu0 %vm362_vm0, %v361_v0 }
   0xd   :  { %340 = vmatpush3.msra.mxu1 %v32_v11  ;;  %349 = vmatpush3.msra.mxu0 %v41_v14 }
   0xe   :  { %341 = vmatprep.subr.mxu1 %v361_v0  ;;  %350 = vmatprep.subr.mxu0 %v361_v0 }
   0xf   :  { %342 = vmatpush3.msra.mxu1 %v31_v12  ;;  %351 = vmatpush3.msra.mxu0 %v40_v20 }
  0x10   :  { %343 = vmatprep.subr.mxu1 %v361_v0  ;;  %352 = vmatprep.subr.mxu0 %v361_v0 }
  0x11   :  { %344 = vmatpush3.msra.mxu1 %v30_v13  ;;  %353 = vmatpush3.msra.mxu0 %v39_v21 }
  0x12   :  { %354 = vmatprep.subr.mxu0 %v361_v0 }
  0x13   :  { %355 = vmatpush3.msra.mxu0 %v38_v22 }
  0xc9   :  { %v122_v16 = vpop.f32.mrf.mxu0 }
  0xca   :  { %v123_v17 = vadd.f32 %v293_v15, %v122_v16 }
  0xcb   :  { %v328_v18 = vpop.f32.mrf.mxu0 }
  0xcc   :  { %v126_v19 = vmax.f32 %v123_v17, 0.0 }
  0xce   :  { %346 = vmatmul.mubr.msk.f32.vlgmr.msra.gmra.mxu1 %vm133_vm2, %v126_v19 }
 0x18e   :  { %v203_v24 = vpop.f32.mrf.mxu1 }
 0x18f   :  { %v204_v25 = vadd.f32 %v295_v23, %v203_v24 }
 0x190   :  { %v347_v26 = vpop.f32.mrf.mxu1 }
 0x191   :  { %v207_v27 = vmax.f32 %v204_v25, 0.0 }
 0x193   :  { %357 = vmatmul.mubr.msk.f32.vlgmr.msra.gmra.mxu0 %vm52_vm1, %v207_v27 }
 0x253   :  { %v283_v29 = vpop.f32.mrf.mxu0 }
 0x254   :  { %v284_v30 = vadd.f32 %v297_v28, %v283_v29 }
 0x255   :  { %v358_v31 = vpop.f32.mrf.mxu0 }
 0x256   :  { %288 = vst.msk [vmem:[%s478_s7] sm:$0xff] %vm287_vm3, %v284_v30 }

// kernel: tpu_custom_call.1
= control target key start
LH: loop header
LB: loop body
LE: loop exit
PB: predicated region body
PF: predicated region fallthrough
CT: control target
= control target key end

     0   :  { %v361_v0 = vmov 0.0   ;;  %vm362_vm0 = vmmov 0   ;;  %vm52_vm1 = vcmask 261120   ;;  %vm133_vm2 = vcmask 523264   ;;  %s471_s1 = inlined_call_operand.vmem [shape: f32[32,64], index: 1, kind: input, shape index: {}]   ;;  %s472_s3 = inlined_call_operand.vmem [shape: f32[64,32], index: 3, kind: input, shape index: {}]   ;;  %s473_s0 = inlined_call_operand.vmem [shape: f32[8,32], index: 0, kind: input, shape index: {}]   ;;  %s474_s5 = inlined_call_operand.vmem [shape: f32[32,2], index: 5, kind: input, shape index: {}]   ;;  %s475_s2 = inlined_call_operand.vmem [shape: f32[1,64], index: 2, kind: input, shape index: {}]   ;;  %s476_s4 = inlined_call_operand.vmem [shape: f32[1,32], index: 4, kind: input, shape index: {}]   ;;  %s477_s6 = inlined_call_operand.vmem [shape: f32[1,2], index: 6, kind: input, shape index: {}]   ;;  %s478_s7 = inlined_call_operand.vmem [shape: f32[8,2], index: 7, kind: output, shape index: {}]  }
   0x1   :  { %318 = vmatprep.subr.mxu0 %v361_v0  ;;  %v29_v1 = vld [vmem:[%s471_s1 + $0x18] sm:$0xff]  ;;  %v28_v2 = vld [vmem:[%s471_s1 + $0x10] sm:$0xff]  ;;  %326 = vmatprep.mubr.msk.f32.mxu0 %vm362_vm0, %v361_v0  ;;  %v27_v4 = vld [vmem:[%s471_s1 + $0x8] sm:$0xff]  ;;  %vm287_vm3 = vcmask 15360  }
   0x2   :  { %319 = vmatpush3.msra.mxu0 %v29_v1  ;;  %329 = vmatprep.subr.mxu1 %v361_v0  ;;  %v37_v3 = vld [vmem:[%s472_s3 + $0x38] sm:$0xff]  ;;  %v36_v5 = vld [vmem:[%s472_s3 + $0x30] sm:$0xff]  ;;  %v35_v6 = vld [vmem:[%s472_s3 + $0x28] sm:$0xff] }
   0x3   :  { %320 = vmatprep.subr.mxu0 %v361_v0  ;;  %330 = vmatpush3.msra.mxu1 %v37_v3  ;;  %v26_v7 = vld [vmem:[%s471_s1] sm:$0xff]  ;;  %v33_v10 = vld [vmem:[%s472_s3 + $0x18] sm:$0xff]  ;;  %v32_v11 = vld [vmem:[%s472_s3 + $0x10] sm:$0xff] }
   0x4   :  { %321 = vmatpush3.msra.mxu0 %v28_v2  ;;  %331 = vmatprep.subr.mxu1 %v361_v0  ;;  %v45_v8 = vld [vmem:[%s473_s0] sm:$0xff]  ;;  %v31_v12 = vld [vmem:[%s472_s3 + $0x8] sm:$0xff]  ;;  %v41_v14 = vld [vmem:[%s474_s5 + $0x18] sm:$0xff] }
   0x5   :  { %322 = vmatprep.subr.mxu0 %v361_v0  ;;  %332 = vmatpush3.msra.mxu1 %v36_v5  ;;  %v34_v9 = vld [vmem:[%s472_s3 + $0x20] sm:$0xff]  ;;  %v40_v20 = vld [vmem:[%s474_s5 + $0x10] sm:$0xff]  ;;  %v39_v21 = vld [vmem:[%s474_s5 + $0x8] sm:$0xff] }
   0x6   :  { %323 = vmatpush3.msra.mxu0 %v27_v4  ;;  %333 = vmatprep.subr.mxu1 %v361_v0  ;;  %v30_v13 = vld [vmem:[%s472_s3] sm:$0xff] }
   0x7   :  { %324 = vmatprep.subr.mxu0 %v361_v0  ;;  %334 = vmatpush3.msra.mxu1 %v35_v6  ;;  %v293_v15 = vld [vmem:[%s475_s2] ss:$0 sm:$0xff] }
   0x8   :  { %325 = vmatpush3.msra.mxu0 %v26_v7  ;;  %335 = vmatprep.subr.mxu1 %v361_v0  ;;  %v38_v22 = vld [vmem:[%s474_s5] sm:$0xff] }
   0x9   :  { %327 = vmatmul.mubr.msk.f32.vlgmr.msra.gmra.mxu0 %vm52_vm1, %v45_v8  ;;  %336 = vmatpush3.msra.mxu1 %v34_v9  ;;  %v295_v23 = vld [vmem:[%s476_s4] ss:$0 sm:$0xff] }
   0xa   :  { %337 = vmatprep.subr.mxu1 %v361_v0  ;;  %345 = vmatprep.mubr.msk.f32.mxu1 %vm362_vm0, %v361_v0  ;;  %v297_v28 = vld [vmem:[%s477_s6] ss:$0 sm:$0xff] }
   0xb   :  { %338 = vmatpush3.msra.mxu1 %v33_v10  ;;  %348 = vmatprep.subr.mxu0 %v361_v0 }
   0xc   :  { %339 = vmatprep.subr.mxu1 %v361_v0  ;;  %356 = vmatprep.mubr.msk.f32.mxu0 %vm362_vm0, %v361_v0 }
   0xd   :  { %340 = vmatpush3.msra.mxu1 %v32_v11  ;;  %349 = vmatpush3.msra.mxu0 %v41_v14 }
   0xe   :  { %341 = vmatprep.subr.mxu1 %v361_v0  ;;  %350 = vmatprep.subr.mxu0 %v361_v0 }
   0xf   :  { %342 = vmatpush3.msra.mxu1 %v31_v12  ;;  %351 = vmatpush3.msra.mxu0 %v40_v20 }
  0x10   :  { %343 = vmatprep.subr.mxu1 %v361_v0  ;;  %352 = vmatprep.subr.mxu0 %v361_v0 }
  0x11   :  { %344 = vmatpush3.msra.mxu1 %v30_v13  ;;  %353 = vmatpush3.msra.mxu0 %v39_v21 }
  0x12   :  { %354 = vmatprep.subr.mxu0 %v361_v0 }
  0x13   :  { %355 = vmatpush3.msra.mxu0 %v38_v22 }
  0xc9   :  { %v122_v16 = vpop.f32.mrf.mxu0 }
  0xca   :  { %v123_v17 = vadd.f32 %v293_v15, %v122_v16 }
  0xcb   :  { %v328_v18 = vpop.f32.mrf.mxu0 }
  0xcc   :  { %v126_v19 = vmax.f32 %v123_v17, 0.0 }
  0xce   :  { %346 = vmatmul.mubr.msk.f32.vlgmr.msra.gmra.mxu1 %vm133_vm2, %v126_v19 }
 0x18e   :  { %v203_v24 = vpop.f32.mrf.mxu1 }
 0x18f   :  { %v204_v25 = vadd.f32 %v295_v23, %v203_v24 }
 0x190   :  { %v347_v26 = vpop.f32.mrf.mxu1 }
 0x191   :  { %v207_v27 = vmax.f32 %v204_v25, 0.0 }
 0x193   :  { %357 = vmatmul.mubr.msk.f32.vlgmr.msra.gmra.mxu0 %vm52_vm1, %v207_v27 }
 0x253   :  { %v283_v29 = vpop.f32.mrf.mxu0 }
 0x254   :  { %v284_v30 = vadd.f32 %v297_v28, %v283_v29 }
 0x255   :  { %v358_v31 = vpop.f32.mrf.mxu0 }
 0x256   :  { %288 = vst.msk [vmem:[%s478_s7] sm:$0xff] %vm287_vm3, %v284_v30 }

</bundles_post_ra>
